<compile_context>
chip_gen: v7x
topology: tpu7x:2x2x1
jax: 0.10.0
libtpu: 0.0.40
codegen_flags: <defaults>
</compile_context>

<pallas_src>
import math
from functools import partial

import jax
import jax.numpy as jnp
from jax.experimental import pallas as pl
from jax.experimental.pallas import tpu as pltpu


def _round_up(x, m):
    return ((x + m - 1) // m) * m


# ---------------------------------------------------------------------------
# Pallas GEMM + bias:  out[Np, Kp] = patches[Np, RCp] @ weight[RCp, Kp] + bias
# ---------------------------------------------------------------------------
def _gemm_bias_kernel(p_ref, w_ref, b_ref, o_ref):
    acc = jnp.dot(p_ref[...], w_ref[...], preferred_element_type=jnp.float32)
    o_ref[...] = (acc + b_ref[...]).astype(o_ref.dtype)


def pallas_matmul_bias(patches, weight_2d, bias_row, out_dtype):
    """patches: [Np, RCp] bf16, weight_2d: [RCp, Kp] bf16, bias_row: [1, Kp] f32."""
    Np, RCp = patches.shape
    RCw, Kp = weight_2d.shape
    assert RCw == RCp and Kp % 128 == 0 and Np % 8 == 0

    # M tile: big (256) when there is enough work, otherwise the full (8-aligned)
    # row extent.  N tile: 256 when it divides Kp (v6e/v7x MXU width), else 128.
    TM = 256 if Np > 256 else Np
    assert Np % TM == 0
    TN = 256 if Kp % 256 == 0 else 128

    out_itemsize = jnp.dtype(out_dtype).itemsize
    cost = pl.CostEstimate(
        flops=2 * Np * RCp * Kp,
        transcendentals=0,
        bytes_accessed=(Np * RCp * patches.dtype.itemsize
                        + RCp * Kp * weight_2d.dtype.itemsize
                        + Kp * 4
                        + Np * Kp * out_itemsize),
    )

    return pl.pallas_call(
        _gemm_bias_kernel,
        out_shape=jax.ShapeDtypeStruct((Np, Kp), out_dtype),
        grid_spec=pltpu.PrefetchScalarGridSpec(
            num_scalar_prefetch=0,
            # K-tiles outer, M-tiles inner: the weight/bias block index stays
            # constant across the whole inner M sweep, so the weight tile is
            # DMA'd once per output column-strip while patches stream over M.
            grid=(Kp // TN, Np // TM),
            in_specs=[
                pl.BlockSpec((TM, RCp), lambda j, i: (i, 0)),
                pl.BlockSpec((RCp, TN), lambda j, i: (0, j)),
                pl.BlockSpec((1, TN), lambda j, i: (0, j)),
            ],
            out_specs=pl.BlockSpec((TM, TN), lambda j, i: (i, j)),
        ),
        compiler_params=pltpu.CompilerParams(
            dimension_semantics=("parallel", "parallel")),
        cost_estimate=cost,
    )(patches, weight_2d, bias_row)


# ---------------------------------------------------------------------------
# Neighborhood row-index computation (glue; pure int indexing, no FLOPs)
# ---------------------------------------------------------------------------
def _neighbor_rows(indices, spatial_shape, batch_size, kernel_size,
                   stride, padding, dilation, sentinel):
    """[N, R] int32 feature-row id per (output site, kernel offset).

    Submanifold semantics: output sites == input sites.  Invalid / inactive
    neighbors get `sentinel` (index of an appended all-zero feature row).
    Only a dense *int32* lookup grid is built — never a dense feature grid.
    """
    HW0, HW1, HW2 = spatial_shape
    RS0, RS1, RS2 = kernel_size
    N = indices.shape[0]

    grid = jnp.full((batch_size, HW0, HW1, HW2), sentinel, jnp.int32)
    grid = grid.at[indices[:, 0], indices[:, 1], indices[:, 2],
                   indices[:, 3]].set(jnp.arange(N, dtype=jnp.int32))

    r0, r1, r2 = jnp.meshgrid(jnp.arange(RS0), jnp.arange(RS1),
                              jnp.arange(RS2), indexing="ij")
    roff = jnp.stack([r0.ravel(), r1.ravel(), r2.ravel()], -1).astype(jnp.int32)

    stride_a = jnp.asarray(stride, jnp.int32)
    pad_a = jnp.asarray(padding, jnp.int32)
    dil_a = jnp.asarray(dilation, jnp.int32)
    hw_a = jnp.asarray([HW0, HW1, HW2], jnp.int32)

    out_xyz = indices[:, 1:4].astype(jnp.int32)                       # [N, 3]
    in_xyz = (out_xyz[:, None, :] * stride_a - pad_a
              + roff[None, :, :] * dil_a)                             # [N, R, 3]
    valid = jnp.all((in_xyz >= 0) & (in_xyz < hw_a), axis=-1)         # [N, R]
    cc = jnp.clip(in_xyz, 0, hw_a - 1)
    b = indices[:, 0].astype(jnp.int32)[:, None]
    rows = grid[b, cc[..., 0], cc[..., 1], cc[..., 2]]                # [N, R]
    return jnp.where(valid, rows, sentinel)


# ---------------------------------------------------------------------------
# Jitted forward (one executable: neighbor lookup + im2col gather + Pallas GEMM)
# ---------------------------------------------------------------------------
@partial(jax.jit, static_argnames=("spatial_shape", "batch_size",
                                   "kernel_size", "stride", "padding",
                                   "dilation"))
def _submconv3d_forward(features, indices, weight, bias, *, spatial_shape,
                        batch_size, kernel_size, stride, padding, dilation):
    RS0, RS1, RS2 = kernel_size
    K = weight.shape[0]
    C = weight.shape[-1]
    N = features.shape[0]
    R = RS0 * RS1 * RS2

    # ---- padding plan -------------------------------------------------------
    # Lane-align the contraction dim (R*C) by adding zero kernel "slots" when
    # cheap; otherwise fall back to a small zero column pad.
    period = 128 // math.gcd(C, 128)
    pad_slots = (-R) % period
    if pad_slots * C > 128:
        pad_slots = 0
    R_pad = R + pad_slots
    RCp = _round_up(R_pad * C, 128)
    Kp = _round_up(K, 128)
    Np = _round_up(N, 256) if N > 256 else _round_up(N, 8)

    # ---- im2col as one gather into the padded bf16 patches buffer -----------
    nbr = _neighbor_rows(indices, spatial_shape, batch_size, kernel_size,
                         stride, padding, dilation, sentinel=N)       # [N, R]
    nbr_full = jnp.full((Np, R_pad), N, jnp.int32)
    nbr_full = nbr_full.at[:N, :R].set(nbr)

    feats_bf16 = features.astype(jnp.bfloat16)
    feats_ext = jnp.concatenate(
        [feats_bf16, jnp.zeros((1, C), jnp.bfloat16)], axis=0)        # zero row
    patches = feats_ext[nbr_full].reshape(Np, R_pad * C)              # bf16
    if patches.shape[1] != RCp:
        # Rare fallback (e.g. odd C): small zero column pad.
        patches = jnp.pad(patches, ((0, 0), (0, RCp - patches.shape[1])))

    # ---- weight [K,R0,R1,R2,C] -> [RCp, Kp] bf16, bias -> [1, Kp] f32 -------
    w2d = jnp.transpose(weight, (1, 2, 3, 4, 0)).reshape(R * C, K)
    w2d = jnp.pad(w2d.astype(jnp.bfloat16),
                  ((0, RCp - R * C), (0, Kp - K)))
    bias_row = jnp.pad(bias.astype(jnp.float32)[None, :],
                       ((0, 0), (0, Kp - K)))

    # ---- hot path: Pallas streaming GEMM + bias ------------------------------
    out = pallas_matmul_bias(patches, w2d, bias_row, features.dtype)
    return out[:N, :K]


# ---------------------------------------------------------------------------
# Module
# ---------------------------------------------------------------------------
class PallasSubMConv3d:
    """JAX/Pallas port of TritonSubMConv3d (forward only)."""

    def __init__(self, in_channels, out_channels, kernel_size, stride=1,
                 padding=0, dilation=1, bias=True, dtype=jnp.float32,
                 key=jax.random.PRNGKey(0)):
        self.C = in_channels
        self.K = out_channels
        t3 = lambda v: (v, v, v) if isinstance(v, int) else tuple(v)
        self.RS = t3(kernel_size)
        self.str_hw = t3(stride)
        self.pad_hw = t3(padding)
        self.dil_hw = t3(dilation)

        wkey, bkey = jax.random.split(key)
        # Same parameter shapes as the PyTorch module ([K, R0, R1, R2, C]);
        # deterministic non-trivial init instead of zeros.
        wshape = (self.K, self.RS[0], self.RS[1], self.RS[2], self.C)
        fan_in = self.C * self.RS[0] * self.RS[1] * self.RS[2]
        self.weight = jax.random.normal(wkey, wshape, dtype) * (fan_in ** -0.5)
        self.bias = jax.random.normal(bkey, (self.K,), dtype) if bias else None

    def __call__(self, features, indices, spatial_shape, batch_size):
        assert len(spatial_shape) == 3
        HW = tuple(int(s) for s in spatial_shape)

        # NOTE: the PyTorch forward passes (str_hw_1, str_hw_1, str_hw_2) as the
        # stride — reproduced verbatim for exact semantics.
        stride = (self.str_hw[1], self.str_hw[1], self.str_hw[2])
        padding = self.pad_hw
        dilation = self.dil_hw

        # Output spatial shape by the conv formula (== HW for standard SubM
        # configs: stride 1, pad = dil*(RS-1)//2).
        PQ = [
            (HW[d] + 2 * padding[d] - dilation[d] * (self.RS[d] - 1) - 1)
            // stride[d] + 1
            for d in range(3)
        ]

        bias = (self.bias if self.bias is not None
                else jnp.zeros((self.K,), jnp.float32))
        out_features = _submconv3d_forward(
            features, indices, self.weight, bias,
            spatial_shape=HW, batch_size=int(batch_size),
            kernel_size=self.RS, stride=stride, padding=padding,
            dilation=dilation)
        out_indices = indices  # submanifold: output sites == input sites
        return out_features, out_indices, PQ


# ---------------------------------------------------------------------------
# Independent pure-JAX reference (dense feature grid path) for the self-test
# ---------------------------------------------------------------------------
def _reference_submconv(features, indices, spatial_shape, batch_size,
                        weight, bias, kernel_size, stride, padding, dilation):
    # Use bf16-rounded operands so the comparison isolates accumulation error.
    f = features.astype(jnp.bfloat16).astype(jnp.float32)
    w = weight.astype(jnp.bfloat16).astype(jnp.float32)
    HW0, HW1, HW2 = spatial_shape
    N, C = f.shape
    K = w.shape[0]
    RS0, RS1, RS2 = kernel_size

    dense = jnp.zeros((batch_size, HW0, HW1, HW2, C), jnp.float32)
    dense = dense.at[indices[:, 0], indices[:, 1], indices[:, 2],
                     indices[:, 3]].set(f)

    r0, r1, r2 = jnp.meshgrid(jnp.arange(RS0), jnp.arange(RS1),
                              jnp.arange(RS2), indexing="ij")
    roff = jnp.stack([r0.ravel(), r1.ravel(), r2.ravel()], -1)
    stride_a = jnp.asarray(stride, jnp.int32)
    pad_a = jnp.asarray(padding, jnp.int32)
    dil_a = jnp.asarray(dilation, jnp.int32)
    hw_a = jnp.asarray([HW0, HW1, HW2], jnp.int32)

    out_xyz = indices[:, 1:4].astype(jnp.int32)
    in_xyz = out_xyz[:, None, :] * stride_a - pad_a + roff[None] * dil_a
    valid = jnp.all((in_xyz >= 0) & (in_xyz < hw_a), axis=-1)
    cc = jnp.clip(in_xyz, 0, hw_a - 1)
    b = indices[:, 0].astype(jnp.int32)[:, None]
    g = dense[b, cc[..., 0], cc[..., 1], cc[..., 2]] * valid[..., None]
    patches = g.reshape(N, -1)
    w2d = jnp.transpose(w, (1, 2, 3, 4, 0)).reshape(-1, K)
    out = patches @ w2d
    if bias is not None:
        out = out + bias.astype(jnp.float32)[None, :]
    return out


if __name__ == "__main__":
    key = jax.random.PRNGKey(0)
    k_idx, k_feat, k_param = jax.random.split(key, 3)

    # Small SparseConvTensor-like inputs.
    batch_size = 2
    spatial_shape = [8, 8, 8]
    C, K = 4, 8
    N = 50  # number of active voxels

    total = batch_size * spatial_shape[0] * spatial_shape[1] * spatial_shape[2]
    flat = jax.random.choice(k_idx, total, shape=(N,), replace=False)
    b = flat // (spatial_shape[0] * spatial_shape[1] * spatial_shape[2])
    rem = flat % (spatial_shape[0] * spatial_shape[1] * spatial_shape[2])
    z = rem // (spatial_shape[1] * spatial_shape[2])
    rem = rem % (spatial_shape[1] * spatial_shape[2])
    y = rem // spatial_shape[2]
    x = rem % spatial_shape[2]
    indices = jnp.stack([b, z, y, x], axis=-1).astype(jnp.int32)   # [N, 4]
    features = jax.random.normal(k_feat, (N, C), jnp.float32)      # [N, C]

    conv = PallasSubMConv3d(in_channels=C, out_channels=K, kernel_size=3,
                            stride=1, padding=1, dilation=1, bias=True,
                            key=k_param)

    out_features, out_indices, PQ = conv(features, indices, spatial_shape,
                                         batch_size)
    out_features = jax.block_until_ready(out_features)

    # Independent reference (dense feature-grid im2col + f32 matmul on the
    # same bf16-rounded operands).  bf16 operands => loosened tolerance.
    stride_quirk = (conv.str_hw[1], conv.str_hw[1], conv.str_hw[2])
    ref = _reference_submconv(features, indices, tuple(spatial_shape),
                              batch_size, conv.weight, conv.bias, conv.RS,
                              stride_quirk, conv.pad_hw, conv.dil_hw)

    assert out_features.shape == (N, K)
    assert out_indices.shape == (N, 4)
    assert PQ == spatial_shape
    assert jnp.allclose(out_features, ref, atol=1e-2, rtol=1e-2), (
        float(jnp.max(jnp.abs(out_features - ref))))

    print("KERNEL_OK")
</pallas_src>

<mosaic_0001>
module attributes {stable_mosaic.version = 11 : i64} {
  func.func @_gemm_bias_kernel(%arg0: i32, %arg1: i32, %arg2: memref<56x128xbf16, #tpu.memory_space<vmem>>, %arg3: memref<128x128xbf16, #tpu.memory_space<vmem>>, %arg4: memref<1x128xf32, #tpu.memory_space<vmem>>, %arg5: memref<56x128xf32, #tpu.memory_space<vmem>>) attributes {dimension_semantics = [#tpu.dimension_semantics<parallel>, #tpu.dimension_semantics<parallel>], iteration_bounds = array<i64: 1, 1>, scalar_prefetch = 0 : i64, scratch_operands = 0 : i64, tpu.core_type = #tpu.core_type<tc>, window_params = [{transform_indices = @transform_0, window_bounds = array<i64: 56, 128>}, {transform_indices = @transform_1, window_bounds = array<i64: 128, 128>}, {transform_indices = @transform_2, window_bounds = array<i64: 1, 128>}, {transform_indices = @transform_3, window_bounds = array<i64: 56, 128>}]} {
    %c0 = arith.constant 0 : index
    %c0_0 = arith.constant 0 : index
    %0 = vector.load %arg2[%c0, %c0_0] : memref<56x128xbf16, #tpu.memory_space<vmem>>, vector<56x128xbf16>
    %c0_1 = arith.constant 0 : index
    %c0_2 = arith.constant 0 : index
    %1 = vector.load %arg3[%c0_1, %c0_2] : memref<128x128xbf16, #tpu.memory_space<vmem>>, vector<128x128xbf16>
    %cst = arith.constant dense<0.000000e+00> : vector<56x128xf32>
    %2 = tpu.matmul %0, %1, %cst {dimension_numbers = #tpu.dot_dimension_numbers<[1], [0], [0], [1], [0, 0, 1, 1], [], []>} : vector<56x128xbf16>, vector<128x128xbf16>, vector<56x128xf32> -> vector<56x128xf32>
    %c0_3 = arith.constant 0 : index
    %c0_4 = arith.constant 0 : index
    %3 = vector.load %arg4[%c0_3, %c0_4] : memref<1x128xf32, #tpu.memory_space<vmem>>, vector<1x128xf32>
    %4 = vector.broadcast %3 : vector<1x128xf32> to vector<56x128xf32>
    %5 = arith.addf %2, %4 : vector<56x128xf32>
    %c0_5 = arith.constant 0 : index
    %c0_6 = arith.constant 0 : index
    %6 = vector.load %arg5[%c0_5, %c0_6] : memref<56x128xf32, #tpu.memory_space<vmem>>, vector<56x128xf32>
    tpu.vector_store %arg5[%c0_5, %c0_6], %5 {strides = array<i32>} : memref<56x128xf32, #tpu.memory_space<vmem>>, vector<56x128xf32>,
    return
  }
  func.func @transform_0(%arg0: i32, %arg1: i32) -> (i32, i32) {
    %c0_i32 = arith.constant 0 : i32
    %c0_i32_0 = arith.constant 0 : i32
    return %arg1, %c0_i32 : i32, i32
  }
  func.func @transform_1(%arg0: i32, %arg1: i32) -> (i32, i32) {
    %c0_i32 = arith.constant 0 : i32
    %c0_i32_0 = arith.constant 0 : i32
    return %c0_i32, %arg0 : i32, i32
  }
  func.func @transform_2(%arg0: i32, %arg1: i32) -> (i32, i32) {
    %c0_i32 = arith.constant 0 : i32
    %c0_i32_0 = arith.constant 0 : i32
    return %c0_i32, %arg0 : i32, i32
  }
  func.func @transform_3(%arg0: i32, %arg1: i32) -> (i32, i32) {
    %c0_i32 = arith.constant 0 : i32
    return %arg1, %arg0 : i32, i32
  }
}

</mosaic_0001>

<bundles_post_ra>
// kernel: _submconv3d_forward.1
= control target key start
LH: loop header
LB: loop body
LE: loop exit
PB: predicated region body
PF: predicated region fallthrough
CT: control target
= control target key end

     0   :  { %s347_s1 = inlined_call_operand.vmem [shape: bf16[128,128], index: 1, kind: input, shape index: {}]   ;;  %s348_s0 = inlined_call_operand.vmem [shape: bf16[56,128], index: 0, kind: input, shape index: {}]   ;;  %s349_s2 = inlined_call_operand.vmem [shape: f32[1,128], index: 2, kind: input, shape index: {}]   ;;  %s350_s3 = inlined_call_operand.vmem [shape: f32[56,128], index: 3, kind: output, shape index: {}]  }
   0x1   :  { %v255_v0 = vld [vmem:[%s347_s1] sm:$0xff]   ;;  %v256_v1 = vld [vmem:[%s347_s1 + $0x8] sm:$0xff]   ;;  %v257_v2 = vld [vmem:[%s347_s1 + $0x10] sm:$0xff]  }
   0x2   :  { %215 = vmatprep.subr.bf16.mxu0 %v255_v0  ;;  %239 = vmatprep.subr.bf16.mxu1 %v255_v0  ;;  %v258_v3 = vld [vmem:[%s347_s1 + $0x18] sm:$0xff]   ;;  %v263_v4 = vld [vmem:[%s348_s0] sm:$0xff]   ;;  %v264_v5 = vld [vmem:[%s348_s0 + $0x10] sm:$0xff]  }
   0x3   :  { %216 = vmatpush3.bf16.msra.mxu0 %v255_v0  ;;  %247 = vmatpush3.bf16.msra.mxu1 %v255_v0  ;;  %v259_v6 = vld [vmem:[%s347_s1 + $0x20] sm:$0xff]   ;;  %v260_v7 = vld [vmem:[%s347_s1 + $0x28] sm:$0xff]   ;;  %v261_v8 = vld [vmem:[%s347_s1 + $0x30] sm:$0xff]  }
   0x4   :  { %217 = vmatprep.subr.bf16.mxu0 %v256_v1  ;;  %240 = vmatprep.subr.bf16.mxu1 %v256_v1  ;;  %v262_v9 = vld [vmem:[%s347_s1 + $0x38] sm:$0xff]   ;;  %v265_v10 = vld [vmem:[%s348_s0 + $0x8] sm:$0xff]   ;;  %v190_v12 = vld [vmem:[%s349_s2] ss:$0 sm:$0xff] }
   0x5   :  { %231 = vmatprep.mubr.bf16.mxu0 %v263_v4  ;;  %235 = vmatprep.mubr.bf16.mxu1 %v264_v5  ;;  %v266_v11 = vld [vmem:[%s348_s0 + $0x18] ss:$0 sps:$4 sm:$0xff]  }
   0x7   :  { %218 = vmatpush3.bf16.msra.mxu0 %v256_v1  ;;  %248 = vmatpush3.bf16.msra.mxu1 %v256_v1 }
   0x8   :  { %219 = vmatprep.subr.bf16.mxu0 %v257_v2  ;;  %241 = vmatprep.subr.bf16.mxu1 %v257_v2 }
   0xb   :  { %220 = vmatpush3.bf16.msra.mxu0 %v257_v2  ;;  %249 = vmatpush3.bf16.msra.mxu1 %v257_v2 }
   0xc   :  { %221 = vmatprep.subr.bf16.mxu0 %v258_v3  ;;  %242 = vmatprep.subr.bf16.mxu1 %v258_v3 }
   0xf   :  { %222 = vmatpush3.bf16.msra.mxu0 %v258_v3  ;;  %250 = vmatpush3.bf16.msra.mxu1 %v258_v3 }
  0x10   :  { %223 = vmatprep.subr.bf16.mxu0 %v259_v6  ;;  %243 = vmatprep.subr.bf16.mxu1 %v259_v6 }
  0x13   :  { %224 = vmatpush3.bf16.msra.mxu0 %v259_v6  ;;  %251 = vmatpush3.bf16.msra.mxu1 %v259_v6 }
  0x14   :  { %225 = vmatprep.subr.bf16.mxu0 %v260_v7  ;;  %244 = vmatprep.subr.bf16.mxu1 %v260_v7 }
  0x17   :  { %226 = vmatpush3.bf16.msra.mxu0 %v260_v7  ;;  %252 = vmatpush3.bf16.msra.mxu1 %v260_v7 }
  0x18   :  { %227 = vmatprep.subr.bf16.mxu0 %v261_v8  ;;  %245 = vmatprep.subr.bf16.mxu1 %v261_v8 }
  0x1b   :  { %228 = vmatpush3.bf16.msra.mxu0 %v261_v8  ;;  %253 = vmatpush3.bf16.msra.mxu1 %v261_v8 }
  0x1c   :  { %229 = vmatprep.subr.bf16.mxu0 %v262_v9  ;;  %246 = vmatprep.subr.bf16.mxu1 %v262_v9 }
  0x1f   :  { %230 = vmatpush3.bf16.msra.mxu0 %v262_v9  ;;  %254 = vmatpush3.bf16.msra.mxu1 %v262_v9 }
  0x22   :  { %232 = vmatmul.mubr.bf16.vlgmr.msra.gmra.mrb[0].mxu0 %v265_v10  ;;  %236 = vmatmul.mubr.bf16.vlgmr.msra.gmra.mrb[0].mxu1 %v266_v11 }
  0xf5   :  { %v233_v13 = vpop.f32.mrb[0].mxu0  ;;  %v237_v14 = vpop.f32.mrb[0].mxu1 }
  0xf6   :  { %v158_v15 = vadd.f32 %v233_v13, %v190_v12  ;;  %v174_v16 = vadd.f32 %v237_v14, %v190_v12  ;;  %v149_v17 = vpop.f32.mrb[1].mxu0  ;;  %v165_v18 = vpop.f32.mrb[1].mxu1 }
  0xf7   :  { %v150_v19 = vadd.f32 %v190_v12, %v149_v17  ;;  %v166_v20 = vadd.f32 %v190_v12, %v165_v18  ;;  %v234_v21 = vpop.f32.mrb[2].mxu0  ;;  %v238_v22 = vpop.f32.mrb[2].mxu1 }
  0xf8   :  { %181 = vst [vmem:[%s350_s3 + $0x10] sm:$0xff] %v158_v15  ;;  %185 = vst [vmem:[%s350_s3 + $0x30] sm:$0xff] %v174_v16  ;;  %v161_v23 = vadd.f32 %v234_v21, %v190_v12  ;;  %v152_v24 = vpop.f32.mrb[3].mxu0  ;;  %v168_v25 = vpop.f32.mrb[3].mxu1 }
  0xf9   :  { %179 = vst [vmem:[%s350_s3] sm:$0xff] %v150_v19  ;;  %183 = vst [vmem:[%s350_s3 + $0x20] sm:$0xff] %v166_v20  ;;  %v153_v26 = vadd.f32 %v190_v12, %v152_v24  ;;  %v169_v27 = vadd.f32 %v190_v12, %v168_v25 }
  0xfa   :  { %182 = vst [vmem:[%s350_s3 + $0x18] sm:$0xff] %v161_v23 }
  0xfb   :  { %180 = vst [vmem:[%s350_s3 + $0x8] sm:$0xff] %v153_v26  ;;  %184 = vst [vmem:[%s350_s3 + $0x28] sm:$0xff] %v169_v27 }

</bundles_post_ra>
